<compile_context>
chip_gen: v5e
topology: v5e:2x2
jax: 0.10.0
libtpu: 0.0.40
codegen_flags: <defaults>
</compile_context>

<pallas_src>
import functools

import jax
import jax.numpy as jnp
from jax.experimental import pallas as pl
from jax.experimental.pallas import tpu as pltpu


def _baseline_kernel(w_time_ref, base_t_ref, base_r_ref, w_pair_ref,
                     obs_ref, mask_ref, out_ref, *, batch_size):
    # w_time_ref : SMEM (4,)          -> [w_t, w_t2, w_t3, w_ones]
    # base_t_ref : SMEM (num_tiles,)  -> float(block_start // B)
    # base_r_ref : SMEM (num_tiles,)  -> float(block_start %  B)
    # w_pair_ref : VMEM (D, 2)        -> col 0 = weight[:D], col 1 = weight[D:2D]
    # obs_ref    : VMEM (D, NT)  obs block, lane-dense on the flattened T*B axis
    # mask_ref   : VMEM (1, NT)
    # out_ref    : VMEM (1, NT)
    i = pl.program_id(0)

    obs = obs_ref[...].astype(jnp.float32)                # (D, NT)
    mask = mask_ref[...]                                   # (1, NT)

    w_pair = w_pair_ref[...]                               # (D, 2)
    w_obs = w_pair[:, 0:1]                                 # (D, 1)
    w_obs2 = w_pair[:, 1:2]                                # (D, 1)

    # obs @ w[:D] + obs**2 @ w[D:2D]  ==  sum_d obs * (w_obs + obs * w_obs2)
    v = jnp.sum(obs * (w_obs + obs * w_obs2), axis=0, keepdims=True)   # (1, NT)

    # Regenerate time_step in-kernel (no tau HBM stream):
    #   flat index = block_start + j,   t = start//B + floor((start%B + j)/B)
    # The floor-divide is computed in f32 (operands are exact integers < 2^24)
    # with a +-1 correction, so the quotient is exact.
    nt = mask.shape[-1]
    b_f = jnp.float32(batch_size)
    j = jax.lax.broadcasted_iota(jnp.int32, (1, nt), 1).astype(jnp.float32)
    num = j + base_r_ref[i]                                # (1, NT)
    q = jnp.floor(num * (1.0 / batch_size))
    r = num - q * b_f                                      # exact integer residue
    q = q + jnp.where(r >= b_f, 1.0, 0.0) - jnp.where(r < 0.0, 1.0, 0.0)
    t = base_t_ref[i] + q                                  # timestep index (f32)

    w_t = w_time_ref[0]
    w_t2 = w_time_ref[1]
    w_t3 = w_time_ref[2]
    w_one = w_time_ref[3]

    # ts == time_step = t * mask / 100  (holds for arbitrary mask values).
    ts = t * mask * jnp.float32(0.01)
    poly = mask * w_one + ts * (w_t + ts * (w_t2 + ts * w_t3))   # Horner

    out_ref[...] = v + poly


def _round_up(x, m):
    return (x + m - 1) // m * m


def _choose_tile(n, d, max_tile, vmem_budget_bytes, obs_itemsize):
    """Lane-tile size from a VMEM budget + balanced tile count."""
    d_pad = _round_up(max(d, 1), 8)
    # Live VMEM per grid step: obs + mask inputs double-buffered, out double-
    # buffered; each (1, n_tile) row occupies 8 sublanes in VMEM.
    bytes_per_lane = 2 * d_pad * obs_itemsize + 2 * 8 * 4 + 2 * 8 * 4
    tile_cap = max(512, (vmem_budget_bytes // bytes_per_lane) // 512 * 512)
    max_tile = max(512, min(max_tile, tile_cap))

    num_tiles = pl.cdiv(n, max_tile)
    if num_tiles > 1 and num_tiles % 2:
        num_tiles += 1                     # even count: megacore splits evenly
    n_tile = _round_up(pl.cdiv(n, num_tiles), 512)
    return n_tile, num_tiles


def linear_feature_baseline_forward(observations, mask, weight, *,
                                    max_tile=16384,
                                    vmem_budget_bytes=12 * 1024 * 1024,
                                    obs_in_bf16=False):
    """observations: (T,B,D), mask: (T,B), weight: (2D+4,)  ->  (T,B) f32."""
    T, B, D = observations.shape
    F = 2 * D + 4
    assert weight.shape == (F,)
    assert mask.shape == (T, B)
    N = T * B

    obs_store_dtype = jnp.bfloat16 if obs_in_bf16 else jnp.float32
    obs_itemsize = jnp.dtype(obs_store_dtype).itemsize

    n_tile, num_tiles = _choose_tile(N, D, max_tile, vmem_budget_bytes,
                                     obs_itemsize)
    n_pad = n_tile * num_tiles
    pad = n_pad - N

    # --- layout plumbing: ONE fused pad+transpose(+cast) copy for obs -------
    obs2d = observations.reshape(N, D)
    if pad:
        obs2d = jnp.pad(obs2d, ((0, pad), (0, 0)))
    obs_lane = obs2d.T.astype(obs_store_dtype)             # (D, n_pad)

    mask_flat = mask.reshape(1, N).astype(jnp.float32)     # (1, N)
    if pad:
        mask_flat = jnp.pad(mask_flat, ((0, 0), (0, pad)))

    # Per-block time bases (tiny, SMEM): block_start // B and block_start % B.
    starts = jnp.arange(num_tiles, dtype=jnp.int32) * n_tile
    base_t = (starts // B).astype(jnp.float32)
    base_r = (starts % B).astype(jnp.float32)

    w = weight.astype(jnp.float32)
    w_pair = jnp.stack([w[:D], w[D:2 * D]], axis=1)        # (D, 2)
    w_time = w[2 * D:]                                     # (4,)

    cost = pl.CostEstimate(
        flops=int(n_pad * (4 * D + 18)),
        transcendentals=0,
        bytes_accessed=int(n_pad * D * obs_itemsize        # obs read
                           + n_pad * 4                     # mask read
                           + n_pad * 4),                   # out write
    )

    kernel = functools.partial(_baseline_kernel, batch_size=B)

    out = pl.pallas_call(
        kernel,
        out_shape=jax.ShapeDtypeStruct((1, n_pad), jnp.float32),
        grid=(num_tiles,),
        in_specs=[
            pl.BlockSpec(memory_space=pltpu.SMEM),          # w_time (4,)
            pl.BlockSpec(memory_space=pltpu.SMEM),          # base_t (num_tiles,)
            pl.BlockSpec(memory_space=pltpu.SMEM),          # base_r (num_tiles,)
            pl.BlockSpec((D, 2), lambda i: (0, 0)),          # w_pair (resident)
            pl.BlockSpec((D, n_tile), lambda i: (0, i)),     # obs stream
            pl.BlockSpec((1, n_tile), lambda i: (0, i)),     # mask stream
        ],
        out_specs=pl.BlockSpec((1, n_tile), lambda i: (0, i)),
        compiler_params=pltpu.CompilerParams(
            dimension_semantics=("parallel",),
            vmem_limit_bytes=32 * 1024 * 1024,
        ),
        cost_estimate=cost,
    )(w_time, base_t, base_r, w_pair, obs_lane, mask_flat)

    return out[0, :N].reshape(T, B)


def _reference_forward(observations, mask, weight):
    """Pure-JAX replica of the PyTorch forward (builds the full feature matrix)."""
    T, B, D = observations.shape
    ones = mask[..., None]                                   # (T, B, 1)
    lens = jnp.arange(T, dtype=observations.dtype)
    time_step = lens.reshape(-1, 1, 1) * ones / 100.0        # (T, B, 1)
    feats = jnp.concatenate(
        [observations, observations ** 2, time_step, time_step ** 2,
         time_step ** 3, ones], axis=2)                      # (T, B, 2D+4)
    values = feats.reshape(-1, feats.shape[-1]) @ weight
    return values.reshape(T, B)


if __name__ == "__main__":
    key = jax.random.PRNGKey(0)
    k_obs, k_w, k_obs2, k_w2, k_len = jax.random.split(key, 5)

    # --- small demo shape: seq 8, batch 2, obs dim 6 -> feature_size 16 -----
    T, B, D = 8, 2, 6
    F = 2 * D + 4
    observations = jax.random.normal(k_obs, (T, B, D), dtype=jnp.float32)
    lengths = jnp.array([8, 5])                              # ragged episodes
    mask = (jnp.arange(T)[:, None] < lengths[None, :]).astype(jnp.float32)
    # The module zero-inits weight; use deterministic random weights so the
    # forward pass is non-trivial.
    weight = jax.random.normal(k_w, (F,), dtype=jnp.float32)

    out = jax.block_until_ready(
        linear_feature_baseline_forward(observations, mask, weight))
    ref = _reference_forward(observations, mask, weight)
    assert out.shape == (T, B)
    assert jnp.allclose(out, ref, atol=1e-5, rtol=1e-5), (out, ref)

    # --- multi-tile / padded-N exercise: two grid blocks, B does not divide
    #     the tile (nonzero per-block remainder in the time-base table) -------
    T2, B2, D2 = 300, 73, 6
    F2 = 2 * D2 + 4
    obs2 = jax.random.normal(k_obs2, (T2, B2, D2), dtype=jnp.float32)
    lens2 = jax.random.randint(k_len, (B2,), 1, T2 + 1)
    mask2 = (jnp.arange(T2)[:, None] < lens2[None, :]).astype(jnp.float32)
    weight2 = jax.random.normal(k_w2, (F2,), dtype=jnp.float32)

    out2 = jax.block_until_ready(
        linear_feature_baseline_forward(obs2, mask2, weight2))
    ref2 = _reference_forward(obs2, mask2, weight2)
    assert out2.shape == (T2, B2)
    assert jnp.allclose(out2, ref2, atol=1e-4, rtol=1e-5), (
        float(jnp.max(jnp.abs(out2 - ref2))))

    print("KERNEL_OK")
</pallas_src>

<mosaic_0001>
module attributes {stable_mosaic.version = 11 : i64} {
  func.func @_baseline_kernel(%arg0: i32, %arg1: memref<4xf32, #tpu.memory_space<smem>>, %arg2: memref<1xf32, #tpu.memory_space<smem>>, %arg3: memref<1xf32, #tpu.memory_space<smem>>, %arg4: memref<6x2xf32, #tpu.memory_space<vmem>>, %arg5: memref<6x512xf32, #tpu.memory_space<vmem>>, %arg6: memref<1x512xf32, #tpu.memory_space<vmem>>, %arg7: memref<1x512xf32, #tpu.memory_space<vmem>>) attributes {dimension_semantics = [#tpu.dimension_semantics<parallel>], iteration_bounds = array<i64: 1>, scalar_prefetch = 0 : i64, scratch_operands = 0 : i64, tpu.core_type = #tpu.core_type<tc>, window_params = [{transform_indices = @transform_0, window_bounds = array<i64: 4>}, {transform_indices = @transform_1, window_bounds = array<i64: 1>}, {transform_indices = @transform_2, window_bounds = array<i64: 1>}, {pipeline_mode = #tpu.pipeline_mode<synchronous>, transform_indices = @transform_3, window_bounds = array<i64: 6, 2>}, {transform_indices = @transform_4, window_bounds = array<i64: 6, 512>}, {transform_indices = @transform_5, window_bounds = array<i64: 1, 512>}, {transform_indices = @transform_6, window_bounds = array<i64: 1, 512>}]} {
    %c0 = arith.constant 0 : index
    %c0_0 = arith.constant 0 : index
    %0 = vector.load %arg5[%c0, %c0_0] : memref<6x512xf32, #tpu.memory_space<vmem>>, vector<6x512xf32>
    %c0_1 = arith.constant 0 : index
    %c0_2 = arith.constant 0 : index
    %1 = vector.load %arg6[%c0_1, %c0_2] : memref<1x512xf32, #tpu.memory_space<vmem>>, vector<1x512xf32>
    %c0_3 = arith.constant 0 : index
    %c0_4 = arith.constant 0 : index
    %2 = vector.load %arg4[%c0_3, %c0_4] : memref<6x2xf32, #tpu.memory_space<vmem>>, vector<6x2xf32>
    %3 = vector.extract_strided_slice %2 {offsets = [0, 0], sizes = [6, 1], strides = [1, 1]} : vector<6x2xf32> to vector<6x1xf32>
    %4 = vector.extract_strided_slice %2 {offsets = [0, 1], sizes = [6, 1], strides = [1, 1]} : vector<6x2xf32> to vector<6x1xf32>
    %5 = vector.broadcast %4 : vector<6x1xf32> to vector<6x512xf32>
    %6 = arith.mulf %0, %5 : vector<6x512xf32>
    %7 = vector.broadcast %3 : vector<6x1xf32> to vector<6x512xf32>
    %8 = arith.addf %7, %6 : vector<6x512xf32>
    %9 = arith.mulf %0, %8 : vector<6x512xf32>
    %cst = arith.constant dense<0.000000e+00> : vector<512xf32>
    %10 = vector.multi_reduction <add>, %9, %cst [0] : vector<6x512xf32> to vector<512xf32>
    %11 = vector.shape_cast %10 : vector<512xf32> to vector<1x512xf32>
    %12 = tpu.iota {dimensions = array<i32: 1>} : vector<1x512xi32>
    %13 = arith.sitofp %12 : vector<1x512xi32> to vector<1x512xf32>
    %14 = arith.index_cast %arg0 : i32 to index
    %15 = memref.load %arg3[%14] : memref<1xf32, #tpu.memory_space<smem>>
    %16 = vector.broadcast %15 : f32 to vector<1x512xf32>
    %17 = arith.addf %13, %16 : vector<1x512xf32>
    %cst_5 = arith.constant 5.000000e-01 : f32
    %18 = vector.broadcast %cst_5 : f32 to vector<1x512xf32>
    %19 = arith.mulf %17, %18 : vector<1x512xf32>
    %20 = math.floor %19 : vector<1x512xf32>
    %cst_6 = arith.constant 2.000000e+00 : f32
    %21 = vector.broadcast %cst_6 : f32 to vector<1x512xf32>
    %22 = arith.mulf %20, %21 : vector<1x512xf32>
    %23 = arith.subf %17, %22 : vector<1x512xf32>
    %cst_7 = arith.constant 2.000000e+00 : f32
    %24 = vector.broadcast %cst_7 : f32 to vector<1x512xf32>
    %25 = arith.cmpf oge, %23, %24 : vector<1x512xf32>
    %cst_8 = arith.constant 1.000000e+00 : f32
    %cst_9 = arith.constant 0.000000e+00 : f32
    %26 = vector.broadcast %cst_8 : f32 to vector<1x512xf32>
    %27 = vector.broadcast %cst_9 : f32 to vector<1x512xf32>
    %28 = arith.select %25, %26, %27 : vector<1x512xi1>, vector<1x512xf32>
    %29 = arith.addf %20, %28 : vector<1x512xf32>
    %cst_10 = arith.constant 0.000000e+00 : f32
    %30 = vector.broadcast %cst_10 : f32 to vector<1x512xf32>
    %31 = arith.cmpf olt, %23, %30 : vector<1x512xf32>
    %cst_11 = arith.constant 1.000000e+00 : f32
    %cst_12 = arith.constant 0.000000e+00 : f32
    %32 = vector.broadcast %cst_11 : f32 to vector<1x512xf32>
    %33 = vector.broadcast %cst_12 : f32 to vector<1x512xf32>
    %34 = arith.select %31, %32, %33 : vector<1x512xi1>, vector<1x512xf32>
    %35 = arith.subf %29, %34 : vector<1x512xf32>
    %36 = arith.index_cast %arg0 : i32 to index
    %37 = memref.load %arg2[%36] : memref<1xf32, #tpu.memory_space<smem>>
    %38 = vector.broadcast %37 : f32 to vector<1x512xf32>
    %39 = arith.addf %38, %35 : vector<1x512xf32>
    %c0_13 = arith.constant 0 : index
    %40 = memref.load %arg1[%c0_13] : memref<4xf32, #tpu.memory_space<smem>>
    %c1 = arith.constant 1 : index
    %41 = memref.load %arg1[%c1] : memref<4xf32, #tpu.memory_space<smem>>
    %c2 = arith.constant 2 : index
    %42 = memref.load %arg1[%c2] : memref<4xf32, #tpu.memory_space<smem>>
    %c3 = arith.constant 3 : index
    %43 = memref.load %arg1[%c3] : memref<4xf32, #tpu.memory_space<smem>>
    %44 = arith.mulf %39, %1 : vector<1x512xf32>
    %cst_14 = arith.constant 0.00999999977 : f32
    %45 = vector.broadcast %cst_14 : f32 to vector<1x512xf32>
    %46 = arith.mulf %44, %45 : vector<1x512xf32>
    %47 = vector.broadcast %43 : f32 to vector<1x512xf32>
    %48 = arith.mulf %1, %47 : vector<1x512xf32>
    %49 = vector.broadcast %42 : f32 to vector<1x512xf32>
    %50 = arith.mulf %46, %49 : vector<1x512xf32>
    %51 = vector.broadcast %41 : f32 to vector<1x512xf32>
    %52 = arith.addf %51, %50 : vector<1x512xf32>
    %53 = arith.mulf %46, %52 : vector<1x512xf32>
    %54 = vector.broadcast %40 : f32 to vector<1x512xf32>
    %55 = arith.addf %54, %53 : vector<1x512xf32>
    %56 = arith.mulf %46, %55 : vector<1x512xf32>
    %57 = arith.addf %48, %56 : vector<1x512xf32>
    %58 = arith.addf %11, %57 : vector<1x512xf32>
    %c0_15 = arith.constant 0 : index
    %c0_16 = arith.constant 0 : index
    %59 = vector.load %arg7[%c0_15, %c0_16] : memref<1x512xf32, #tpu.memory_space<vmem>>, vector<1x512xf32>
    tpu.vector_store %arg7[%c0_15, %c0_16], %58 {strides = array<i32>} : memref<1x512xf32, #tpu.memory_space<vmem>>, vector<1x512xf32>,
    return
  }
  func.func @transform_0(%arg0: i32) -> i32 {
    %c0_i32 = arith.constant 0 : i32
    %c0_i32_0 = arith.constant 0 : i32
    return %c0_i32 : i32
  }
  func.func @transform_1(%arg0: i32) -> i32 {
    %c0_i32 = arith.constant 0 : i32
    %c0_i32_0 = arith.constant 0 : i32
    return %c0_i32 : i32
  }
  func.func @transform_2(%arg0: i32) -> i32 {
    %c0_i32 = arith.constant 0 : i32
    %c0_i32_0 = arith.constant 0 : i32
    return %c0_i32 : i32
  }
  func.func @transform_3(%arg0: i32) -> (i32, i32) {
    %c0_i32 = arith.constant 0 : i32
    %c0_i32_0 = arith.constant 0 : i32
    %c0_i32_1 = arith.constant 0 : i32
    return %c0_i32, %c0_i32_0 : i32, i32
  }
  func.func @transform_4(%arg0: i32) -> (i32, i32) {
    %c0_i32 = arith.constant 0 : i32
    %c0_i32_0 = arith.constant 0 : i32
    return %c0_i32, %arg0 : i32, i32
  }
  func.func @transform_5(%arg0: i32) -> (i32, i32) {
    %c0_i32 = arith.constant 0 : i32
    %c0_i32_0 = arith.constant 0 : i32
    return %c0_i32, %arg0 : i32, i32
  }
  func.func @transform_6(%arg0: i32) -> (i32, i32) {
    %c0_i32 = arith.constant 0 : i32
    %c0_i32_0 = arith.constant 0 : i32
    return %c0_i32, %arg0 : i32, i32
  }
}

</mosaic_0001>

<bundles_post_ra>
// kernel: tpu_custom_call.1
= control target key start
LH: loop header
LB: loop body
LE: loop exit
PB: predicated region body
PF: predicated region fallthrough
CT: control target
= control target key end

     0   :  { %13 = vsyncpa [#allocation7], 0  ;;  %s435_s0 = inlined_call_operand.vmem [shape: f32[4], index: 0, kind: input, shape index: {}]   ;;  %s436_s1 = inlined_call_operand.<no memory space> [shape: f32[1], index: 1, kind: input, shape index: {}]   ;;  %s437_s2 = inlined_call_operand.<no memory space> [shape: f32[1], index: 2, kind: input, shape index: {}]   ;;  %s438_s3 = inlined_call_operand.vmem [shape: f32[6,2], index: 3, kind: input, shape index: {}]   ;;  %s439_s4 = inlined_call_operand.hbm [shape: f32[6,512], index: 4, kind: input, shape index: {}]   ;;  %s440_s5 = inlined_call_operand.vmem [shape: f32[1,512], index: 5, kind: input, shape index: {}]   ;;  %s441_s6 = inlined_call_operand.hbm [shape: f32[1,512], index: 6, kind: output, shape index: {}]  }
   0x1   :  { %14 = vsyncpa [#allocation5], 0 }
   0x2   :  { %15 = vsyncpa [#allocation6], 0  ;;  %s21_s23 = sshll.u32 %s435_s0, 4  ;;  %s36_s26 = sshll.u32 %s439_s4, 4  ;;  %s22_s23 = int_to_ptr.vmem [resolvable:$true] %s21_s23  ;;  %s37_s26 = int_to_ptr.hbm [resolvable:$true] %s36_s26 }
   0x3   :  { %s355_s27 = smov [#allocation4]   ;;  %s356_s28 = smov [#allocation8]  }
   0x4   :  { %24 = dma.vmem_to_smem %s22_s23, 16, %s355_s27, [#allocation7]  }
   0x5   :  { %s38_s29 = sshll.u32 %s356_s28, 4  ;;  %s39_s29 = int_to_ptr.vmem [resolvable:$true] %s38_s29 }
   0x6   :  { %41 = dma.hbm_to_vmem [thread:$0]  %s37_s26, 512, %s39_s29, [#allocation5]  }
   0x7   :  { %349 = dma.done.wait [#allocation7], 16  }
   0x8   :  { %350 = vsyncadd [#allocation7], 4294967280 }
   0x9   :  { %351 = dma.done.wait [#allocation5], 512  }
   0xa   :  { %352 = vsyncadd [#allocation5], 4294966784 }
   0xb   :  { %52 = sfence }
   0xc   :  { %v58_v0 = vld [vmem:[%s438_s3] sm:$0x3f]  ;;  %v357_v1 = vmov 1   ;;  %v358_v2 = vmov 0   ;;  %v109_v3 = vlaneseq  ;;  %v119_v11 = vstv %s437_s2  ;;  %s278_s10 = sld [smem:[#allocation4 + $0x1]]  ;;  %s360_s12 = smov [#allocation9]  }
   0xd   :  { %287 = vset.pattern.permute.xlu0 %v357_v1  ;;  %v359_v33 = vmov 0.0   ;;  %v412_v42 = vld [vmem:[%s440_s5] sm:$0xf]  ;;  %v165_v51 = vstv %s436_s1  ;;  %s279_s5 = sld [smem:[#allocation4 + $0x2]]  ;;  %vm223_vm8 = vcmask 1040384   ;;  %vm225_vm9 = vcmask 1042434  }
   0xe   :  { %61 = vperm.xlu0 %287, %v58_v0   ;;  %v110_v4 = vand.u32 127, %v109_v3  ;;  %v176_v53 = vperm.slane %v412_v42, 1  ;;  %v177_v54 = vperm.slane %v412_v42, 2  ;;  %v178_v57 = vperm.slane %v412_v42, 3  ;;  %s170_s1 = sld [smem:[#allocation4]]  ;;  %s265_s13 = sshll.u32 %s360_s12, 4  ;;  %s266_s13 = int_to_ptr.vmem [resolvable:$true] %s265_s13 }
   0xf   :  { %v175_v59 = vperm.slane %v412_v42, 0  ;;  %s421_s11 = sld [smem:[#allocation4 + $0x3]]  ;;  %vm227_vm10 = vcmask 1041408   ;;  %vm80_vm11 = vcmask 1045504   ;;  %s267_s16 = sshll.u32 %s441_s6, 4  ;;  %vm257_vm12 = vcmp.lt.s32.totalorder %v109_v3, 512  ;;  %s268_s16 = int_to_ptr.hbm [resolvable:$true] %s267_s16 }
  0x10   :  { %v111_v5 = vadd.s32 128, %v110_v4  ;;  %v112_v6 = vadd.s32 256, %v110_v4  ;;  %v113_v7 = vadd.s32 384, %v110_v4  ;;  %v114_v12 = vcvt.s32.f32 %v110_v4 }
  0x12   :  { %v115_v8 = vcvt.s32.f32 %v111_v5  ;;  %v116_v9 = vcvt.s32.f32 %v112_v6  ;;  %v117_v10 = vcvt.s32.f32 %v113_v7  ;;  %v120_v16 = vadd.f32 %v119_v11, %v114_v12 }
  0x13   :  { %v193_v4 = vstv %s279_s5 }
  0x14   :  { %v121_v13 = vadd.f32 %v119_v11, %v115_v8  ;;  %v122_v14 = vadd.f32 %v119_v11, %v116_v9  ;;  %v123_v15 = vadd.f32 %v119_v11, %v117_v10  ;;  %v124_v20 = vmul.f32 0.5, %v120_v16 }
  0x15   :  { %v198_v9 = vstv %s278_s10 }
  0x16   :  { %288 = vset.pattern.permute.xlu0 %v358_v2  ;;  %v125_v17 = vmul.f32 0.5, %v121_v13  ;;  %v126_v18 = vmul.f32 0.5, %v122_v14  ;;  %v127_v19 = vmul.f32 0.5, %v123_v15  ;;  %v128_v24 = vfloor.f32 %v124_v20 }
  0x17   :  { %69 = vperm.xlu0 %288, %v58_v0  }
  0x18   :  { %v129_v21 = vfloor.f32 %v125_v17  ;;  %v130_v22 = vfloor.f32 %v126_v18  ;;  %v131_v23 = vfloor.f32 %v127_v19  ;;  %v132_v28 = vmul.f32 2.0, %v128_v24 }
  0x19   :  { %v207_v18 = vstv %s170_s1 }
  0x1a   :  { %v133_v25 = vmul.f32 2.0, %v129_v21  ;;  %v134_v26 = vmul.f32 2.0, %v130_v22  ;;  %v135_v27 = vmul.f32 2.0, %v131_v23  ;;  %v136_v32 = vsub.f32 %v120_v16, %v132_v28  ;;  %v53_v28 = vld [vmem:[#allocation8] sm:$0x3f] }
  0x1c   :  { %v137_v29 = vsub.f32 %v121_v13, %v133_v25  ;;  %v138_v30 = vsub.f32 %v122_v14, %v134_v26  ;;  %v139_v31 = vsub.f32 %v123_v15, %v135_v27  ;;  %vm140_vm3 = vcmp.ge.f32.partialorder %v136_v32, 2.0 }
  0x1d   :  { %v144_v37 = vsel %vm140_vm3, 1.0, %v359_v33  ;;  %vm152_vm4 = vcmp.lt.f32.partialorder %v136_v32, 0.0 }
  0x1e   :  { %vm141_vm0 = vcmp.ge.f32.partialorder %v137_v29, 2.0  ;;  %vm142_vm1 = vcmp.ge.f32.partialorder %v138_v30, 2.0  ;;  %vm143_vm2 = vcmp.ge.f32.partialorder %v139_v31, 2.0  ;;  %v148_v40 = vadd.f32 %v144_v37, %v128_v24 }
  0x1f   :  { %v145_v34 = vsel %vm141_vm0, 1.0, %v359_v33  ;;  %v146_v35 = vsel %vm142_vm1, 1.0, %v359_v33  ;;  %v147_v36 = vsel %vm143_vm2, 1.0, %v359_v33  ;;  %vm153_vm5 = vcmp.lt.f32.partialorder %v137_v29, 0.0  ;;  %v54_v29 = vld [vmem:[#allocation8 + $0x8] sm:$0x3f] }
  0x20   :  { %v149_v38 = vadd.f32 %v145_v34, %v129_v21  ;;  %v150_v39 = vadd.f32 %v146_v35, %v130_v22  ;;  %v151_v41 = vadd.f32 %v147_v36, %v131_v23  ;;  %vm154_vm6 = vcmp.lt.f32.partialorder %v138_v30, 0.0  ;;  %v55_v30 = vld [vmem:[#allocation8 + $0x10] sm:$0x3f] }
  0x21   :  { %vm155_vm7 = vcmp.lt.f32.partialorder %v139_v31, 0.0  ;;  %v156_v43 = vsel %vm152_vm4, 1.0, %v359_v33  ;;  %v157_v44 = vsel %vm153_vm5, 1.0, %v359_v33  ;;  %v158_v45 = vsel %vm154_vm6, 1.0, %v359_v33  ;;  %v56_v31 = vld [vmem:[#allocation8 + $0x18] sm:$0x3f] }
  0x22   :  { %v159_v46 = vsel %vm155_vm7, 1.0, %v359_v33  ;;  %v161_v47 = vsub.f32 %v149_v38, %v157_v44  ;;  %v160_v48 = vsub.f32 %v148_v40, %v156_v43  ;;  %v162_v49 = vsub.f32 %v150_v39, %v158_v45 }
  0x23   :  { %v163_v50 = vsub.f32 %v151_v41, %v159_v46  ;;  %v191_v41 = vstv %s421_s11 }
  0x24   :  { %v167_v52 = vadd.f32 %v165_v51, %v161_v47  ;;  %v168_v55 = vadd.f32 %v165_v51, %v162_v49  ;;  %v166_v58 = vadd.f32 %v165_v51, %v160_v48 }
  0x25   :  { %v169_v56 = vadd.f32 %v165_v51, %v163_v50 }
  0x26   :  { %v184_v60 = vmul.f32 %v176_v53, %v167_v52  ;;  %v185_v61 = vmul.f32 %v177_v54, %v168_v55  ;;  %v183_v63 = vmul.f32 %v175_v59, %v166_v58  ;;  %v192_v53 = vmul.f32 %v191_v41, %v412_v42 }
  0x27   :  { %v186_v62 = vmul.f32 %v178_v57, %v169_v56 }
  0x28   :  { %v188_v0 = vmul.f32 0.01, %v184_v60  ;;  %v189_v1 = vmul.f32 0.01, %v185_v61  ;;  %v187_v5 = vmul.f32 0.01, %v183_v63 }
  0x29   :  { %v190_v2 = vmul.f32 0.01, %v186_v62 }
  0x2a   :  { %v195_v6 = vmul.f32 %v193_v4, %v188_v0  ;;  %v196_v7 = vmul.f32 %v193_v4, %v189_v1  ;;  %v194_v10 = vmul.f32 %v193_v4, %v187_v5 }
  0x2b   :  { %v197_v8 = vmul.f32 %v193_v4, %v190_v2 }
  0x2c   :  { %v200_v11 = vadd.f32 %v198_v9, %v195_v6  ;;  %v201_v12 = vadd.f32 %v198_v9, %v196_v7  ;;  %v199_v14 = vadd.f32 %v198_v9, %v194_v10 }
  0x2d   :  { %v202_v13 = vadd.f32 %v198_v9, %v197_v8 }
  0x2e   :  { %v204_v15 = vmul.f32 %v200_v11, %v188_v0  ;;  %v205_v16 = vmul.f32 %v201_v12, %v189_v1  ;;  %v203_v19 = vmul.f32 %v199_v14, %v187_v5 }
  0x2f   :  { %v206_v17 = vmul.f32 %v202_v13, %v190_v2 }
  0x30   :  { %v209_v20 = vadd.f32 %v207_v18, %v204_v15  ;;  %v210_v21 = vadd.f32 %v207_v18, %v205_v16  ;;  %v208_v24 = vadd.f32 %v207_v18, %v203_v19 }
  0x31   :  { %v211_v22 = vadd.f32 %v207_v18, %v206_v17 }
  0x32   :  { %v213_v25 = vmul.f32 %v209_v20, %v188_v0  ;;  %v214_v26 = vmul.f32 %v210_v21, %v189_v1  ;;  %v212_v32 = vmul.f32 %v208_v24, %v187_v5 }
  0x33   :  { %v215_v27 = vmul.f32 %v211_v22, %v190_v2 }
  0x34   :  { %v220_v33 = vrot.slane %v213_v25, 7  ;;  %v221_v34 = vrot.slane %v214_v26, 6 }
  0x35   :  { %v222_v35 = vrot.slane %v215_v27, 5 }
  0x36   :  { %v224_v43 = vsel %vm223_vm8, %v212_v32, %v220_v33 }
  0x37   :  { %v226_v44 = vsel %vm225_vm9, %v221_v34, %v222_v35 }
  0x38   :  { %v228_v54 = vsel %vm227_vm10, %v224_v43, %v226_v44 }
  0x39   :  { %v230_v4 = vadd.f32 %v228_v54, %v192_v53 }
  0x3b   :  { %v233_v12 = vperm.slane %v230_v4, 1  ;;  %v234_v13 = vperm.slane %v230_v4, 2  ;;  %v235_v14 = vperm.slane %v230_v4, 3  ;;  %v232_v19 = vperm.slane %v230_v4, 0 }
  0x80   :  { %v62_v23 = vpop.permute.xlu0 %61 }
  0x81   :  { %v64_v36 = vmul.f32 %v62_v23, %v53_v28  ;;  %v65_v37 = vmul.f32 %v62_v23, %v54_v29  ;;  %v66_v38 = vmul.f32 %v62_v23, %v55_v30  ;;  %v67_v39 = vmul.f32 %v62_v23, %v56_v31 }
  0x89   :  { %v70_v40 = vpop.permute.xlu0 %69 }
  0x8a   :  { %v72_v45 = vadd.f32 %v70_v40, %v64_v36  ;;  %v73_v46 = vadd.f32 %v70_v40, %v65_v37  ;;  %v74_v47 = vadd.f32 %v70_v40, %v66_v38  ;;  %v75_v48 = vadd.f32 %v70_v40, %v67_v39 }
  0x8c   :  { %v76_v49 = vmul.f32 %v72_v45, %v53_v28  ;;  %v77_v50 = vmul.f32 %v73_v46, %v54_v29  ;;  %v78_v51 = vmul.f32 %v74_v47, %v55_v30  ;;  %v79_v52 = vmul.f32 %v75_v48, %v56_v31 }
  0x8e   :  { %v81_v55 = vsel %vm80_vm11, %v76_v49, 0.0  ;;  %v88_v56 = vsel %vm80_vm11, %v77_v50, 0.0  ;;  %v95_v57 = vsel %vm80_vm11, %v78_v51, 0.0  ;;  %v102_v58 = vsel %vm80_vm11, %v79_v52, 0.0 }
  0x8f   :  { %v82_v59 = vrot.slane %v81_v55, 4  ;;  %v89_v60 = vrot.slane %v88_v56, 4  ;;  %v96_v61 = vrot.slane %v95_v57, 4  ;;  %v103_v62 = vrot.slane %v102_v58, 4 }
  0x91   :  { %v83_v63 = vadd.f32 %v82_v59, %v81_v55  ;;  %v90_v0 = vadd.f32 %v89_v60, %v88_v56  ;;  %v97_v1 = vadd.f32 %v96_v61, %v95_v57  ;;  %v104_v2 = vadd.f32 %v103_v62, %v102_v58 }
  0x93   :  { %v84_v5 = vrot.slane %v83_v63, 2  ;;  %v91_v6 = vrot.slane %v90_v0, 2  ;;  %v98_v7 = vrot.slane %v97_v1, 2  ;;  %v105_v8 = vrot.slane %v104_v2, 2 }
  0x95   :  { %v85_v42 = vadd.f32 %v84_v5, %v83_v63  ;;  %v92_v9 = vadd.f32 %v91_v6, %v90_v0  ;;  %v99_v10 = vadd.f32 %v98_v7, %v97_v1  ;;  %v106_v11 = vadd.f32 %v105_v8, %v104_v2 }
  0x97   :  { %v86_v15 = vrot.slane %v85_v42, 1  ;;  %v93_v16 = vrot.slane %v92_v9, 1  ;;  %v100_v17 = vrot.slane %v99_v10, 1  ;;  %v107_v18 = vrot.slane %v106_v11, 1 }
  0x99   :  { %v87_v20 = vadd.f32 %v86_v15, %v85_v42  ;;  %v94_v21 = vadd.f32 %v93_v16, %v92_v9  ;;  %v101_v22 = vadd.f32 %v100_v17, %v99_v10  ;;  %v108_v23 = vadd.f32 %v107_v18, %v106_v11 }
  0x9b   :  { %v241_v24 = vadd.f32 %v233_v12, %v94_v21  ;;  %v242_v25 = vadd.f32 %v234_v13, %v101_v22  ;;  %v243_v26 = vadd.f32 %v235_v14, %v108_v23  ;;  %v240_v27 = vadd.f32 %v232_v19, %v87_v20 }
  0x9d   :  { %v248_v28 = vrot.slane %v241_v24, 7  ;;  %v249_v29 = vrot.slane %v242_v25, 6  ;;  %v250_v30 = vrot.slane %v243_v26, 5 }
  0x9f   :  { %v251_v31 = vsel %vm223_vm8, %v240_v27, %v248_v28  ;;  %v252_v32 = vsel %vm225_vm9, %v249_v29, %v250_v30 }
  0xa0   :  { %v253_v33 = vsel %vm227_vm10, %v251_v31, %v252_v32 }
  0xa1   :  { %259 = vst.msk [vmem:[#allocation9] sm:$0xf] %vm257_vm12, %v253_v33 }
  0xa2   :  { %270 = dma.vmem_to_hbm [thread:$0]  %s266_s13, 64, %s268_s16, [#allocation6]  }
  0xa3   :  { %353 = dma.done.wait [#allocation6], 64  }
  0xa4   :  { %354 = vsyncadd [#allocation6], 4294967232 }
  0xa5   :  { %275 = vsyncpa [#allocation5], 1 }
  0xa6   :  { %276 = vsyncpa [#allocation6], 1 }
  0xa7   :  { %277 = vsyncpa [#allocation7], 1 }

</bundles_post_ra>
